<compile_context>
chip_gen: v5e
topology: v5e:2x2
jax: 0.10.0
libtpu: 0.0.40
codegen_flags: <defaults>
</compile_context>

<pallas_src>
import jax
import jax.numpy as jnp
from jax.experimental import pallas as pl
from jax.experimental.pallas import tpu as pltpu

IN_DIM = 1580
H1, H2, OUT_DIM = 128, 64, 1
TILE_B_MAX = 512   # f32 x tile: 512*1580*4 B ~ 3.1 MiB; x2 buffers fits every generation's default


def _round_up(x, m):
    return ((x + m - 1) // m) * m


def _choose_tile(B):
    # B <= 512: one grid step (single-TC chips gain nothing from splitting a tiny,
    # mem-bound batch).  B > 512: balanced tiles (minimal batch padding, keeps the
    # grid steps evenly sized for v7x's two TensorCores).
    if B <= TILE_B_MAX:
        return max(8, _round_up(B, 8))          # 8-row sublane alignment (x is f32)
    n_tiles = pl.cdiv(B, TILE_B_MAX)
    return _round_up(pl.cdiv(B, n_tiles), 8)    # always <= TILE_B_MAX


def _mlp_kernel(x_ref, w1_ref, b1_ref, w2_ref, b2_ref, w3_ref, b3_ref, o_ref):
    # x is streamed as f32 (no wrapper pad/cast pass); cast to bf16 here for the
    # MXU dots -- compute has huge slack, so the cast is free.  Accumulate in f32.
    x = x_ref[...].astype(jnp.bfloat16)                               # (tile_b, 1580)

    # fc1 + ReLU   (dropout1 = identity at inference)
    h = jnp.dot(x, w1_ref[...], preferred_element_type=jnp.float32) + b1_ref[...]
    h = jnp.maximum(h, 0.0)                                           # (tile_b, 128) f32

    # fc2 + ReLU   (dropout2 = identity at inference)
    h = jnp.dot(h.astype(jnp.bfloat16), w2_ref[...],
                preferred_element_type=jnp.float32) + b2_ref[...]
    h = jnp.maximum(h, 0.0)                                           # (tile_b, 64) f32

    # fc3 + sigmoid.  A 1-wide MXU matmul wastes a full weight-load/drain cycle;
    # do it on the VPU (multiply) + XLU (lane reduction) in f32.
    y = jnp.sum(h * w3_ref[...], axis=-1, keepdims=True) + b3_ref[...]  # (tile_b, 1) f32
    # Lane-dense epilogue: emit a (1, tile_b) row so the output store is unmasked.
    o_ref[...] = jnp.transpose(jax.nn.sigmoid(y)).astype(o_ref.dtype)   # (1, tile_b)


@jax.jit
def violation_mlp(x, w1, b1, w2, b2, w3, b3):
    B = x.shape[0]
    tile_b = _choose_tile(B)
    B_pad = _round_up(B, tile_b)
    grid_b = B_pad // tile_b

    # x: no K padding, no dtype cast -- only a (cheap) batch-dim pad when B is not a
    # tile multiple.  Weights are tiny: one-time bf16 cast for the MXU layers; fc3
    # weight/bias and all biases stay f32.
    xp = x if B_pad == B else jnp.pad(x, ((0, B_pad - B), (0, 0)))
    w1b = w1.astype(jnp.bfloat16)                                     # (1580, 128)
    w2b = w2.astype(jnp.bfloat16)                                     # (128, 64)
    w3r = jnp.transpose(jnp.asarray(w3, jnp.float32)).reshape(1, H2)  # (1, 64) f32
    b1p = jnp.asarray(b1, jnp.float32).reshape(1, H1)
    b2p = jnp.asarray(b2, jnp.float32).reshape(1, H2)
    b3p = jnp.asarray(b3, jnp.float32).reshape(1, OUT_DIM)

    out = pl.pallas_call(
        _mlp_kernel,
        out_shape=jax.ShapeDtypeStruct((grid_b, tile_b), jnp.float32),
        grid_spec=pl.GridSpec(
            grid=(grid_b,),
            in_specs=[
                pl.BlockSpec((tile_b, IN_DIM), lambda i: (i, 0)),     # x tile (streamed f32)
                pl.BlockSpec((IN_DIM, H1), lambda i: (0, 0)),         # w1 (resident, bf16)
                pl.BlockSpec((1, H1), lambda i: (0, 0)),              # b1
                pl.BlockSpec((H1, H2), lambda i: (0, 0)),             # w2 (resident, bf16)
                pl.BlockSpec((1, H2), lambda i: (0, 0)),              # b2
                pl.BlockSpec((1, H2), lambda i: (0, 0)),              # w3 as a (1, 64) f32 row
                pl.BlockSpec((1, OUT_DIM), lambda i: (0, 0)),         # b3
            ],
            out_specs=pl.BlockSpec((1, tile_b), lambda i: (i, 0)),    # lane-dense output row
        ),
        compiler_params=pltpu.CompilerParams(
            dimension_semantics=("parallel",),                        # shards grid over v7x's 2 TCs
        ),
    )(xp, w1b, b1p, w2b, b2p, w3r, b3p)

    # (grid_b, tile_b) -> (B, 1); padded rows (sigmoid of bias path) are sliced off.
    return out.reshape(B_pad, OUT_DIM)[:B]


def init_params(key):
    """Deterministic init mimicking nn.Linear default (U[-1/sqrt(fan_in), 1/sqrt(fan_in)])."""
    ks = jax.random.split(key, 6)

    def lin(kw, kb, fan_in, fan_out):
        bound = 1.0 / (fan_in ** 0.5)
        w = jax.random.uniform(kw, (fan_in, fan_out), jnp.float32, -bound, bound)
        b = jax.random.uniform(kb, (1, fan_out), jnp.float32, -bound, bound)
        return w, b

    w1, b1 = lin(ks[0], ks[1], IN_DIM, H1)
    w2, b2 = lin(ks[2], ks[3], H1, H2)
    w3, b3 = lin(ks[4], ks[5], H2, OUT_DIM)
    return w1, b1, w2, b2, w3, b3


def reference_f32(x, w1, b1, w2, b2, w3, b3):
    h = jnp.maximum(x @ w1 + b1, 0.0)
    h = jnp.maximum(h @ w2 + b2, 0.0)
    return jax.nn.sigmoid(h @ w3 + b3)


def reference_kernel_numerics(x, w1, b1, w2, b2, w3, b3):
    # Matches the kernel: bf16 MXU inputs with f32 accumulation for fc1/fc2,
    # fc3 kept entirely in f32 (the kernel does NOT cast h before fc3).
    bf = lambda a: a.astype(jnp.bfloat16)
    h = jnp.dot(bf(x), bf(w1), preferred_element_type=jnp.float32) + b1
    h = jnp.maximum(h, 0.0)
    h = jnp.dot(bf(h), bf(w2), preferred_element_type=jnp.float32) + b2
    h = jnp.maximum(h, 0.0)
    return jax.nn.sigmoid(h @ w3 + b3)


if __name__ == "__main__":
    key = jax.random.PRNGKey(0)
    kx, kp = jax.random.split(key)

    B = 2  # small batch
    x = jax.random.normal(kx, (B, IN_DIM), jnp.float32)
    params = init_params(kp)

    out = violation_mlp(x, *params)
    out = jax.block_until_ready(out)

    assert out.shape == (B, OUT_DIM)
    ref_k = reference_kernel_numerics(x, *params)
    ref_f = reference_f32(x, *params)
    assert jnp.allclose(out, ref_k, atol=2e-3, rtol=0.0), "mismatch vs kernel-numerics reference"
    assert jnp.allclose(out, ref_f, atol=2e-2, rtol=0.0), "mismatch vs f32 reference"

    print("KERNEL_OK")
</pallas_src>

<mosaic_0001>
module attributes {stable_mosaic.version = 11 : i64} {
  func.func @_mlp_kernel(%arg0: i32, %arg1: memref<8x1580xf32, #tpu.memory_space<vmem>>, %arg2: memref<1580x128xbf16, #tpu.memory_space<vmem>>, %arg3: memref<1x128xf32, #tpu.memory_space<vmem>>, %arg4: memref<128x64xbf16, #tpu.memory_space<vmem>>, %arg5: memref<1x64xf32, #tpu.memory_space<vmem>>, %arg6: memref<1x64xf32, #tpu.memory_space<vmem>>, %arg7: memref<1x1xf32, #tpu.memory_space<vmem>>, %arg8: memref<1x8xf32, #tpu.memory_space<vmem>>) attributes {dimension_semantics = [#tpu.dimension_semantics<parallel>], iteration_bounds = array<i64: 1>, scalar_prefetch = 0 : i64, scratch_operands = 0 : i64, tpu.core_type = #tpu.core_type<tc>, window_params = [{transform_indices = @transform_0, window_bounds = array<i64: 8, 1580>}, {pipeline_mode = #tpu.pipeline_mode<synchronous>, transform_indices = @transform_1, window_bounds = array<i64: 1580, 128>}, {pipeline_mode = #tpu.pipeline_mode<synchronous>, transform_indices = @transform_2, window_bounds = array<i64: 1, 128>}, {pipeline_mode = #tpu.pipeline_mode<synchronous>, transform_indices = @transform_3, window_bounds = array<i64: 128, 64>}, {pipeline_mode = #tpu.pipeline_mode<synchronous>, transform_indices = @transform_4, window_bounds = array<i64: 1, 64>}, {pipeline_mode = #tpu.pipeline_mode<synchronous>, transform_indices = @transform_5, window_bounds = array<i64: 1, 64>}, {pipeline_mode = #tpu.pipeline_mode<synchronous>, transform_indices = @transform_6, window_bounds = array<i64: 1, 1>}, {transform_indices = @transform_7, window_bounds = array<i64: 1, 8>}]} {
    %c0 = arith.constant 0 : index
    %c0_0 = arith.constant 0 : index
    %0 = vector.load %arg1[%c0, %c0_0] : memref<8x1580xf32, #tpu.memory_space<vmem>>, vector<8x1580xf32>
    %1 = arith.truncf %0 : vector<8x1580xf32> to vector<8x1580xbf16>
    %c0_1 = arith.constant 0 : index
    %c0_2 = arith.constant 0 : index
    %2 = vector.load %arg2[%c0_1, %c0_2] : memref<1580x128xbf16, #tpu.memory_space<vmem>>, vector<1580x128xbf16>
    %cst = arith.constant dense<0.000000e+00> : vector<8x128xf32>
    %3 = tpu.matmul %1, %2, %cst {dimension_numbers = #tpu.dot_dimension_numbers<[1], [0], [0], [1], [0, 0, 1, 1], [], []>} : vector<8x1580xbf16>, vector<1580x128xbf16>, vector<8x128xf32> -> vector<8x128xf32>
    %c0_3 = arith.constant 0 : index
    %c0_4 = arith.constant 0 : index
    %4 = vector.load %arg3[%c0_3, %c0_4] : memref<1x128xf32, #tpu.memory_space<vmem>>, vector<1x128xf32>
    %5 = vector.broadcast %4 : vector<1x128xf32> to vector<8x128xf32>
    %6 = arith.addf %3, %5 : vector<8x128xf32>
    %cst_5 = arith.constant 0.000000e+00 : f32
    %7 = vector.broadcast %cst_5 : f32 to vector<8x128xf32>
    %8 = arith.maximumf %6, %7 : vector<8x128xf32>
    %9 = arith.truncf %8 : vector<8x128xf32> to vector<8x128xbf16>
    %c0_6 = arith.constant 0 : index
    %c0_7 = arith.constant 0 : index
    %10 = vector.load %arg4[%c0_6, %c0_7] : memref<128x64xbf16, #tpu.memory_space<vmem>>, vector<128x64xbf16>
    %cst_8 = arith.constant dense<0.000000e+00> : vector<8x64xf32>
    %11 = tpu.matmul %9, %10, %cst_8 {dimension_numbers = #tpu.dot_dimension_numbers<[1], [0], [0], [1], [0, 0, 1, 1], [], []>} : vector<8x128xbf16>, vector<128x64xbf16>, vector<8x64xf32> -> vector<8x64xf32>
    %c0_9 = arith.constant 0 : index
    %c0_10 = arith.constant 0 : index
    %12 = vector.load %arg5[%c0_9, %c0_10] : memref<1x64xf32, #tpu.memory_space<vmem>>, vector<1x64xf32>
    %13 = vector.broadcast %12 : vector<1x64xf32> to vector<8x64xf32>
    %14 = arith.addf %11, %13 : vector<8x64xf32>
    %cst_11 = arith.constant 0.000000e+00 : f32
    %15 = vector.broadcast %cst_11 : f32 to vector<8x64xf32>
    %16 = arith.maximumf %14, %15 : vector<8x64xf32>
    %c0_12 = arith.constant 0 : index
    %c0_13 = arith.constant 0 : index
    %17 = vector.load %arg6[%c0_12, %c0_13] : memref<1x64xf32, #tpu.memory_space<vmem>>, vector<1x64xf32>
    %18 = vector.broadcast %17 : vector<1x64xf32> to vector<8x64xf32>
    %19 = arith.mulf %16, %18 : vector<8x64xf32>
    %cst_14 = arith.constant dense<0.000000e+00> : vector<8xf32>
    %20 = vector.multi_reduction <add>, %19, %cst_14 [1] : vector<8x64xf32> to vector<8xf32>
    %21 = vector.shape_cast %20 : vector<8xf32> to vector<8x1xf32>
    %c0_15 = arith.constant 0 : index
    %c0_16 = arith.constant 0 : index
    %22 = vector.load %arg7[%c0_15, %c0_16] : memref<1x1xf32, #tpu.memory_space<vmem>>, vector<1x1xf32>
    %23 = vector.broadcast %22 : vector<1x1xf32> to vector<8x1xf32>
    %24 = arith.addf %21, %23 : vector<8x1xf32>
    %25 = arith.negf %24 : vector<8x1xf32>
    %26 = math.exp %25 : vector<8x1xf32>
    %cst_17 = arith.constant 1.000000e+00 : f32
    %27 = vector.broadcast %cst_17 : f32 to vector<8x1xf32>
    %28 = arith.addf %27, %26 : vector<8x1xf32>
    %29 = arith.divf %27, %28 : vector<8x1xf32>
    %30 = tpu.transpose %29, [1, 0] : vector<8x1xf32> -> vector<1x8xf32>
    %c0_18 = arith.constant 0 : index
    %c0_19 = arith.constant 0 : index
    %31 = vector.load %arg8[%c0_18, %c0_19] : memref<1x8xf32, #tpu.memory_space<vmem>>, vector<1x8xf32>
    tpu.vector_store %arg8[%c0_18, %c0_19], %30 {strides = array<i32>} : memref<1x8xf32, #tpu.memory_space<vmem>>, vector<1x8xf32>,
    return
  }
  func.func @transform_0(%arg0: i32) -> (i32, i32) {
    %c0_i32 = arith.constant 0 : i32
    %c0_i32_0 = arith.constant 0 : i32
    return %arg0, %c0_i32 : i32, i32
  }
  func.func @transform_1(%arg0: i32) -> (i32, i32) {
    %c0_i32 = arith.constant 0 : i32
    %c0_i32_0 = arith.constant 0 : i32
    %c0_i32_1 = arith.constant 0 : i32
    return %c0_i32, %c0_i32_0 : i32, i32
  }
  func.func @transform_2(%arg0: i32) -> (i32, i32) {
    %c0_i32 = arith.constant 0 : i32
    %c0_i32_0 = arith.constant 0 : i32
    %c0_i32_1 = arith.constant 0 : i32
    return %c0_i32, %c0_i32_0 : i32, i32
  }
  func.func @transform_3(%arg0: i32) -> (i32, i32) {
    %c0_i32 = arith.constant 0 : i32
    %c0_i32_0 = arith.constant 0 : i32
    %c0_i32_1 = arith.constant 0 : i32
    return %c0_i32, %c0_i32_0 : i32, i32
  }
  func.func @transform_4(%arg0: i32) -> (i32, i32) {
    %c0_i32 = arith.constant 0 : i32
    %c0_i32_0 = arith.constant 0 : i32
    %c0_i32_1 = arith.constant 0 : i32
    return %c0_i32, %c0_i32_0 : i32, i32
  }
  func.func @transform_5(%arg0: i32) -> (i32, i32) {
    %c0_i32 = arith.constant 0 : i32
    %c0_i32_0 = arith.constant 0 : i32
    %c0_i32_1 = arith.constant 0 : i32
    return %c0_i32, %c0_i32_0 : i32, i32
  }
  func.func @transform_6(%arg0: i32) -> (i32, i32) {
    %c0_i32 = arith.constant 0 : i32
    %c0_i32_0 = arith.constant 0 : i32
    %c0_i32_1 = arith.constant 0 : i32
    return %c0_i32, %c0_i32_0 : i32, i32
  }
  func.func @transform_7(%arg0: i32) -> (i32, i32) {
    %c0_i32 = arith.constant 0 : i32
    %c0_i32_0 = arith.constant 0 : i32
    return %arg0, %c0_i32 : i32, i32
  }
}

</mosaic_0001>

<bundles_post_ra>
// kernel: violation_mlp.1
= control target key start
LH: loop header
LB: loop body
LE: loop exit
PB: predicated region body
PF: predicated region fallthrough
CT: control target
= control target key end

     0   :  { %vm854_vm0 = vcmask 1045504   ;;  %vm850_vm1 = vcmask 359424   ;;  %vm1116_vm2 = vcmask 523264   ;;  %vm1176_vm7 = vcmask 57344   ;;  %s2146_s1 = inlined_call_operand.vmem [shape: bf16[1580,128], index: 1, kind: input, shape index: {}]   ;;  %s2147_s2 = inlined_call_operand.vmem [shape: f32[1,128], index: 2, kind: input, shape index: {}]   ;;  %s2148_s0 = inlined_call_operand.vmem [shape: f32[8,1580], index: 0, kind: input, shape index: {}]   ;;  %s2149_s4 = inlined_call_operand.vmem [shape: f32[1,64], index: 4, kind: input, shape index: {}]   ;;  %s2150_s3 = inlined_call_operand.vmem [shape: bf16[128,64], index: 3, kind: input, shape index: {}]   ;;  %s2151_s5 = inlined_call_operand.vmem [shape: f32[1,64], index: 5, kind: input, shape index: {}]   ;;  %s2152_s6 = inlined_call_operand.<no memory space> [shape: f32[1,1], index: 6, kind: input, shape index: {}]   ;;  %s2153_s7 = inlined_call_operand.vmem [shape: f32[1,8], index: 7, kind: output, shape index: {}]  }
   0x1   :  { %v1619_v0 = vld [vmem:[%s2146_s1 + $0x38] sm:$0xff]  ;;  %v1618_v4 = vld [vmem:[%s2146_s1 + $0x30] sm:$0xff]  ;;  %v1617_v8 = vld [vmem:[%s2146_s1 + $0x28] sm:$0xff] }
   0x2   :  { %v1635_v1 = vld [vmem:[%s2146_s1 + $0xb8] sm:$0xff]  ;;  %858 = vmatpush.bf16.msra.mxu0 %v1619_v0  ;;  %v1634_v5 = vld [vmem:[%s2146_s1 + $0xb0] sm:$0xff]  ;;  %v1633_v9 = vld [vmem:[%s2146_s1 + $0xa8] sm:$0xff] }
   0x3   :  { %v1643_v2 = vld [vmem:[%s2146_s1 + $0xf8] sm:$0xff]  ;;  %884 = vmatpush.bf16.msra.mxu2 %v1635_v1  ;;  %v1642_v6 = vld [vmem:[%s2146_s1 + $0xf0] sm:$0xff]  ;;  %v1641_v10 = vld [vmem:[%s2146_s1 + $0xe8] sm:$0xff] }
   0x4   :  { %v1627_v3 = vld [vmem:[%s2146_s1 + $0x78] sm:$0xff]  ;;  %897 = vmatpush.bf16.msra.mxu3 %v1643_v2  ;;  %v1626_v7 = vld [vmem:[%s2146_s1 + $0x70] sm:$0xff]  ;;  %v1625_v11 = vld [vmem:[%s2146_s1 + $0x68] sm:$0xff] }
   0x5   :  { %871 = vmatpush.bf16.msra.mxu1 %v1627_v3  ;;  %v1616_v12 = vld [vmem:[%s2146_s1 + $0x20] sm:$0xff]  ;;  %v1615_v16 = vld [vmem:[%s2146_s1 + $0x18] sm:$0xff]  ;;  %v1614_v20 = vld [vmem:[%s2146_s1 + $0x10] sm:$0xff] }
   0x6   :  { %859 = vmatpush.bf16.msra.mxu0 %v1618_v4  ;;  %v1632_v13 = vld [vmem:[%s2146_s1 + $0xa0] sm:$0xff]  ;;  %v1631_v17 = vld [vmem:[%s2146_s1 + $0x98] sm:$0xff]  ;;  %v1630_v21 = vld [vmem:[%s2146_s1 + $0x90] sm:$0xff] }
   0x7   :  { %885 = vmatpush.bf16.msra.mxu2 %v1634_v5  ;;  %v1640_v14 = vld [vmem:[%s2146_s1 + $0xe0] sm:$0xff]  ;;  %v1639_v18 = vld [vmem:[%s2146_s1 + $0xd8] sm:$0xff]  ;;  %v1638_v22 = vld [vmem:[%s2146_s1 + $0xd0] sm:$0xff] }
   0x8   :  { %898 = vmatpush.bf16.msra.mxu3 %v1642_v6  ;;  %v1624_v15 = vld [vmem:[%s2146_s1 + $0x60] sm:$0xff]  ;;  %v1623_v19 = vld [vmem:[%s2146_s1 + $0x58] sm:$0xff]  ;;  %v1622_v23 = vld [vmem:[%s2146_s1 + $0x50] sm:$0xff] }
   0x9   :  { %872 = vmatpush.bf16.msra.mxu1 %v1626_v7  ;;  %v1613_v24 = vld [vmem:[%s2146_s1 + $0x8] sm:$0xff]  ;;  %v1612_v28 = vld [vmem:[%s2146_s1] sm:$0xff]  ;;  %v31_v30 = vld [vmem:[%s2148_s0 + $0x10] sm:$0xff] }
   0xa   :  { %860 = vmatpush.bf16.msra.mxu0 %v1617_v8  ;;  %v1629_v25 = vld [vmem:[%s2146_s1 + $0x88] sm:$0xff]  ;;  %v1628_v29 = vld [vmem:[%s2146_s1 + $0x80] sm:$0xff]  ;;  %v1651_v32 = vld [vmem:[%s2146_s1 + $0x138] sm:$0xff]  ;;  %v44_v38 = vpack.c.bf16 %v31_v30, %v31_v30 }
   0xb   :  { %886 = vmatpush.bf16.msra.mxu2 %v1633_v9  ;;  %v1637_v26 = vld [vmem:[%s2146_s1 + $0xc8] sm:$0xff]  ;;  %v1636_v31 = vld [vmem:[%s2146_s1 + $0xc0] sm:$0xff]  ;;  %v1667_v34 = vld [vmem:[%s2146_s1 + $0x1b8] sm:$0xff] }
   0xc   :  { %899 = vmatpush.bf16.msra.mxu3 %v1641_v10  ;;  %v1621_v27 = vld [vmem:[%s2146_s1 + $0x48] sm:$0xff]  ;;  %v29_v33 = vld [vmem:[%s2148_s0] sm:$0xff]  ;;  %v1675_v35 = vld [vmem:[%s2146_s1 + $0x1f8] sm:$0xff] }
   0xd   :  { %873 = vmatpush.bf16.msra.mxu1 %v1625_v11  ;;  %v32_v36 = vld [vmem:[%s2148_s0 + $0x18] sm:$0xff]  ;;  %v1620_v37 = vld [vmem:[%s2146_s1 + $0x40] sm:$0xff]  ;;  %v42_v40 = vpack.c.bf16 %v29_v33, %v29_v33  ;;  %v30_v41 = vld [vmem:[%s2148_s0 + $0x8] sm:$0xff] }
   0xe   :  { %861 = vmatpush.bf16.msra.mxu0 %v1616_v12  ;;  %v1659_v39 = vld [vmem:[%s2146_s1 + $0x178] sm:$0xff]  ;;  %v1650_v42 = vld [vmem:[%s2146_s1 + $0x130] sm:$0xff]  ;;  %v45_v43 = vpack.c.bf16 %v32_v36, %v32_v36  ;;  %v43_v46 = vpack.c.bf16 %v30_v41, %v30_v41  ;;  %v1649_v48 = vld [vmem:[%s2146_s1 + $0x128] sm:$0xff] }
   0xf   :  { %887 = vmatpush.bf16.msra.mxu2 %v1632_v13  ;;  %v1666_v44 = vld [vmem:[%s2146_s1 + $0x1b0] sm:$0xff]  ;;  %v1665_v49 = vld [vmem:[%s2146_s1 + $0x1a8] sm:$0xff]  ;;  %v1648_v52 = vld [vmem:[%s2146_s1 + $0x120] sm:$0xff] }
  0x10   :  { %900 = vmatpush.bf16.msra.mxu3 %v1640_v14  ;;  %v1674_v45 = vld [vmem:[%s2146_s1 + $0x1f0] sm:$0xff]  ;;  %v1673_v50 = vld [vmem:[%s2146_s1 + $0x1e8] sm:$0xff]  ;;  %v1664_v53 = vld [vmem:[%s2146_s1 + $0x1a0] sm:$0xff] }
  0x11   :  { %874 = vmatpush.bf16.msra.mxu1 %v1624_v15  ;;  %v1658_v47 = vld [vmem:[%s2146_s1 + $0x170] sm:$0xff]  ;;  %v1657_v51 = vld [vmem:[%s2146_s1 + $0x168] sm:$0xff]  ;;  %v1672_v54 = vld [vmem:[%s2146_s1 + $0x1e0] sm:$0xff] }
  0x12   :  { %862 = vmatpush.bf16.msra.mxu0 %v1615_v16  ;;  %v1656_v55 = vld [vmem:[%s2146_s1 + $0x160] sm:$0xff]  ;;  %v1647_v56 = vld [vmem:[%s2146_s1 + $0x118] sm:$0xff]  ;;  %v1646_v60 = vld [vmem:[%s2146_s1 + $0x110] sm:$0xff] }
  0x13   :  { %888 = vmatpush.bf16.msra.mxu2 %v1631_v17  ;;  %v1663_v57 = vld [vmem:[%s2146_s1 + $0x198] sm:$0xff]  ;;  %v1662_v61 = vld [vmem:[%s2146_s1 + $0x190] sm:$0xff]  ;;  %v1645_v0 = vld [vmem:[%s2146_s1 + $0x108] sm:$0xff] }
  0x14   :  { %901 = vmatpush.bf16.msra.mxu3 %v1639_v18  ;;  %v1671_v58 = vld [vmem:[%s2146_s1 + $0x1d8] sm:$0xff]  ;;  %v1670_v62 = vld [vmem:[%s2146_s1 + $0x1d0] sm:$0xff]  ;;  %v1661_v1 = vld [vmem:[%s2146_s1 + $0x188] sm:$0xff] }
  0x15   :  { %875 = vmatpush.bf16.msra.mxu1 %v1623_v19  ;;  %v1655_v59 = vld [vmem:[%s2146_s1 + $0x158] sm:$0xff]  ;;  %v1654_v63 = vld [vmem:[%s2146_s1 + $0x150] sm:$0xff]  ;;  %v1669_v2 = vld [vmem:[%s2146_s1 + $0x1c8] sm:$0xff] }
  0x16   :  { %863 = vmatpush.bf16.msra.mxu0 %v1614_v20  ;;  %v1653_v3 = vld [vmem:[%s2146_s1 + $0x148] sm:$0xff]  ;;  %v1644_v4 = vld [vmem:[%s2146_s1 + $0x100] sm:$0xff]  ;;  %v1683_v7 = vld [vmem:[%s2146_s1 + $0x238] sm:$0xff] }
  0x17   :  { %889 = vmatpush.bf16.msra.mxu2 %v1630_v21  ;;  %v1660_v5 = vld [vmem:[%s2146_s1 + $0x180] sm:$0xff]  ;;  %v35_v8 = vld [vmem:[%s2148_s0 + $0x30] sm:$0xff]  ;;  %v1699_v9 = vld [vmem:[%s2146_s1 + $0x2b8] sm:$0xff] }
  0x18   :  { %902 = vmatpush.bf16.msra.mxu3 %v1638_v22  ;;  %v1668_v6 = vld [vmem:[%s2146_s1 + $0x1c0] sm:$0xff]  ;;  %v36_v11 = vld [vmem:[%s2148_s0 + $0x38] sm:$0xff]  ;;  %v48_v15 = vpack.c.bf16 %v35_v8, %v35_v8  ;;  %v34_v16 = vld [vmem:[%s2148_s0 + $0x28] sm:$0xff] }
  0x19   :  { %876 = vmatpush.bf16.msra.mxu1 %v1622_v23  ;;  %v33_v10 = vld [vmem:[%s2148_s0 + $0x20] sm:$0xff]  ;;  %v1707_v12 = vld [vmem:[%s2146_s1 + $0x2f8] sm:$0xff]  ;;  %v49_v18 = vpack.c.bf16 %v36_v11, %v36_v11  ;;  %v1682_v19 = vld [vmem:[%s2146_s1 + $0x230] sm:$0xff]  ;;  %v47_v22 = vpack.c.bf16 %v34_v16, %v34_v16 }
  0x1a   :  { %864 = vmatpush.bf16.msra.mxu0 %v1613_v24  ;;  %v1652_v13 = vld [vmem:[%s2146_s1 + $0x140] sm:$0xff]  ;;  %v1691_v14 = vld [vmem:[%s2146_s1 + $0x278] sm:$0xff]  ;;  %v46_v17 = vpack.c.bf16 %v33_v10, %v33_v10  ;;  %v1698_v20 = vld [vmem:[%s2146_s1 + $0x2b0] sm:$0xff] }
  0x1b   :  { %890 = vmatpush.bf16.msra.mxu2 %v1629_v25  ;;  %v1706_v21 = vld [vmem:[%s2146_s1 + $0x2f0] sm:$0xff]  ;;  %v1681_v24 = vld [vmem:[%s2146_s1 + $0x228] sm:$0xff]  ;;  %v1704_v30 = vld [vmem:[%s2146_s1 + $0x2e0] sm:$0xff] }
  0x1c   :  { %903 = vmatpush.bf16.msra.mxu3 %v1637_v26  ;;  %v1690_v23 = vld [vmem:[%s2146_s1 + $0x270] sm:$0xff]  ;;  %v1697_v25 = vld [vmem:[%s2146_s1 + $0x2a8] sm:$0xff]  ;;  %v1695_v33 = vld [vmem:[%s2146_s1 + $0x298] sm:$0xff] }
  0x1d   :  { %877 = vmatpush.bf16.msra.mxu1 %v1621_v27  ;;  %v1705_v26 = vld [vmem:[%s2146_s1 + $0x2e8] sm:$0xff]  ;;  %v1678_v36 = vld [vmem:[%s2146_s1 + $0x210] sm:$0xff]  ;;  %v1720_v11 = vld [vmem:[%s2147_s2] ss:$0 sm:$0xff] }
  0x1e   :  { %865 = vmatpush.bf16.msra.mxu0 %v1612_v28  ;;  %v1689_v27 = vld [vmem:[%s2146_s1 + $0x268] sm:$0xff]  ;;  %v1680_v28 = vld [vmem:[%s2146_s1 + $0x220] sm:$0xff]  ;;  %v1710_v41 = vld [vmem:[%s2146_s1 + $0x310] sm:$0x30] }
  0x1f   :  { %891 = vmatpush.bf16.msra.mxu2 %v1628_v29  ;;  %v1696_v29 = vld [vmem:[%s2146_s1 + $0x2a0] sm:$0xff]  ;;  %v1716_v10 = vld [vmem:[%s2150_s3 + $0x28] sm:$0xff]  ;;  %v1714_v16 = vld [vmem:[%s2150_s3 + $0x18] sm:$0xff] }
  0x20   :  { %904 = vmatpush.bf16.msra.mxu3 %v1636_v31  ;;  %v1688_v31 = vld [vmem:[%s2146_s1 + $0x260] sm:$0xff] }
  0x21   :  { %878 = vmatpush.bf16.msra.mxu1 %v1620_v37  ;;  %866 = vmatmul.bf16.vlgmr.msra.gmra.mxu0 %v42_v40  ;;  %v1694_v37 = vld [vmem:[%s2146_s1 + $0x290] sm:$0xff] }
  0x22   :  { %910 = vmatpush.bf16.msrb.mxu0 %v1651_v32  ;;  %892 = vmatmul.bf16.vlgmr.msra.gmra.mxu2 %v44_v38  ;;  %v1679_v32 = vld [vmem:[%s2146_s1 + $0x218] sm:$0xff]  ;;  %v1702_v38 = vld [vmem:[%s2146_s1 + $0x2d0] sm:$0xff] }
  0x23   :  { %936 = vmatpush.bf16.msrb.mxu2 %v1667_v34  ;;  %905 = vmatmul.bf16.vlgmr.msra.gmra.mxu3 %v45_v43  ;;  %v1703_v34 = vld [vmem:[%s2146_s1 + $0x2d8] sm:$0xff]  ;;  %v1576_v40 = vld [vmem:[%s2146_s1 + $0x310] sm:$0xf]  ;;  %v1693_v43 = vld [vmem:[%s2146_s1 + $0x288] sm:$0xff] }
  0x24   :  { %949 = vmatpush.bf16.msrb.mxu3 %v1675_v35  ;;  %879 = vmatmul.bf16.vlgmr.msra.gmra.mxu1 %v43_v46  ;;  %v1687_v35 = vld [vmem:[%s2146_s1 + $0x258] sm:$0xff]  ;;  %v1577_v46 = vor.u32 %v1710_v41, %v1576_v40 }
  0x25   :  { %923 = vmatpush.bf16.msrb.mxu1 %v1659_v39  ;;  %v1686_v39 = vld [vmem:[%s2146_s1 + $0x250] sm:$0xff] }
  0x26   :  { %911 = vmatpush.bf16.msrb.mxu0 %v1650_v42  ;;  %v1677_v42 = vld [vmem:[%s2146_s1 + $0x208] sm:$0xff] }
  0x27   :  { %937 = vmatpush.bf16.msrb.mxu2 %v1666_v44  ;;  %v1701_v44 = vld [vmem:[%s2146_s1 + $0x2c8] sm:$0xff] }
  0x28   :  { %950 = vmatpush.bf16.msrb.mxu3 %v1674_v45  ;;  %v1685_v45 = vld [vmem:[%s2146_s1 + $0x248] sm:$0xff] }
  0x29   :  { %924 = vmatpush.bf16.msrb.mxu1 %v1658_v47  ;;  %v1676_v47 = vld [vmem:[%s2146_s1 + $0x200] sm:$0xff] }
  0x2a   :  { %912 = vmatpush.bf16.msrb.mxu0 %v1649_v48  ;;  %v1692_v48 = vld [vmem:[%s2146_s1 + $0x280] sm:$0xff] }
  0x2b   :  { %938 = vmatpush.bf16.msrb.mxu2 %v1665_v49  ;;  %v37_v49 = vld [vmem:[%s2148_s0 + $0x40] sm:$0xff] }
  0x2c   :  { %951 = vmatpush.bf16.msrb.mxu3 %v1673_v50  ;;  %v39_v50 = vld [vmem:[%s2148_s0 + $0x50] sm:$0xff] }
  0x2d   :  { %925 = vmatpush.bf16.msrb.mxu1 %v1657_v51  ;;  %v1700_v51 = vld [vmem:[%s2146_s1 + $0x2c0] sm:$0xff] }
  0x2e   :  { %913 = vmatpush.bf16.msrb.mxu0 %v1648_v52  ;;  %v40_v52 = vld [vmem:[%s2148_s0 + $0x58] sm:$0xff] }
  0x2f   :  { %939 = vmatpush.bf16.msrb.mxu2 %v1664_v53  ;;  %v1684_v53 = vld [vmem:[%s2146_s1 + $0x240] sm:$0xff] }
  0x30   :  { %952 = vmatpush.bf16.msrb.mxu3 %v1672_v54  ;;  %v856_v54 = vsel %vm854_vm0, %v1577_v46, 0 }
  0x31   :  { %926 = vmatpush.bf16.msrb.mxu1 %v1656_v55  ;;  %v38_v55 = vld [vmem:[%s2148_s0 + $0x48] sm:$0xff] }
  0x32   :  { %914 = vmatpush.bf16.msrb.mxu0 %v1647_v56  ;;  %v50_v56 = vpack.c.bf16 %v37_v49, %v37_v49 }
  0x33   :  { %940 = vmatpush.bf16.msrb.mxu2 %v1663_v57  ;;  %v52_v57 = vpack.c.bf16 %v39_v50, %v39_v50  ;;  %v12_v50 = vstv %s2152_s6 }
  0x34   :  { %953 = vmatpush.bf16.msrb.mxu3 %v1671_v58  ;;  %v53_v58 = vpack.c.bf16 %v40_v52, %v40_v52  ;;  %13 = vst [vmem:[#allocation2] sm:$0x1] %v12_v50 }
  0x35   :  { %927 = vmatpush.bf16.msrb.mxu1 %v1655_v59  ;;  %v51_v59 = vpack.c.bf16 %v38_v55, %v38_v55 }
  0x36   :  { %915 = vmatpush.bf16.msrb.mxu0 %v1646_v60  ;;  %v1709_v60 = vld [vmem:[%s2146_s1 + $0x308] sm:$0xff] }
  0x37   :  { %941 = vmatpush.bf16.msrb.mxu2 %v1662_v61  ;;  %v1708_v61 = vld [vmem:[%s2146_s1 + $0x300] sm:$0xff] }
  0x38   :  { %954 = vmatpush.bf16.msrb.mxu3 %v1670_v62  ;;  %v41_v62 = vld [vmem:[%s2148_s0 + $0x60] sm:$0xff] }
  0x39   :  { %928 = vmatpush.bf16.msrb.mxu1 %v1654_v63  ;;  %v54_v63 = vpack.c.bf16 %v41_v62, %v41_v62 }
  0x3a   :  { %916 = vmatpush.bf16.msrb.mxu0 %v1645_v0 }
  0x3b   :  { %942 = vmatpush.bf16.msrb.mxu2 %v1661_v1 }
  0x3c   :  { %955 = vmatpush.bf16.msrb.mxu3 %v1669_v2 }
  0x3d   :  { %929 = vmatpush.bf16.msrb.mxu1 %v1653_v3  ;;  %v1718_v3 = vld [vmem:[%s2150_s3 + $0x38] sm:$0xff] }
  0x3e   :  { %917 = vmatpush.bf16.msrb.mxu0 %v1644_v4 }
  0x3f   :  { %943 = vmatpush.bf16.msrb.mxu2 %v1660_v5 }
  0x40   :  { %956 = vmatpush.bf16.msrb.mxu3 %v1668_v6 }
  0x41   :  { %930 = vmatpush.bf16.msrb.mxu1 %v1652_v13  ;;  %918 = vmatmul.bf16.vlgmr.msrb.gmra.mxu0 %v46_v17 }
  0x42   :  { %962 = vmatpush.bf16.msra.mxu0 %v1683_v7  ;;  %944 = vmatmul.bf16.vlgmr.msrb.gmra.mxu2 %v48_v15  ;;  %v1717_v7 = vld [vmem:[%s2150_s3 + $0x30] sm:$0xff] }
  0x43   :  { %988 = vmatpush.bf16.msra.mxu2 %v1699_v9  ;;  %957 = vmatmul.bf16.vlgmr.msrb.gmra.mxu3 %v49_v18 }
  0x44   :  { %1001 = vmatpush.bf16.msra.mxu3 %v1707_v12  ;;  %931 = vmatmul.bf16.vlgmr.msrb.gmra.mxu1 %v47_v22  ;;  %v1715_v12 = vld [vmem:[%s2150_s3 + $0x20] sm:$0xff] }
  0x45   :  { %975 = vmatpush.bf16.msra.mxu1 %v1691_v14 }
  0x46   :  { %963 = vmatpush.bf16.msra.mxu0 %v1682_v19  ;;  %v1713_v19 = vld [vmem:[%s2150_s3 + $0x10] sm:$0xff] }
  0x47   :  { %989 = vmatpush.bf16.msra.mxu2 %v1698_v20 }
  0x48   :  { %1002 = vmatpush.bf16.msra.mxu3 %v1706_v21 }
  0x49   :  { %976 = vmatpush.bf16.msra.mxu1 %v1690_v23 }
  0x4a   :  { %964 = vmatpush.bf16.msra.mxu0 %v1681_v24  ;;  %v1712_v24 = vld [vmem:[%s2150_s3 + $0x8] sm:$0xff] }
  0x4b   :  { %990 = vmatpush.bf16.msra.mxu2 %v1697_v25 }
  0x4c   :  { %1003 = vmatpush.bf16.msra.mxu3 %v1705_v26 }
  0x4d   :  { %977 = vmatpush.bf16.msra.mxu1 %v1689_v27 }
  0x4e   :  { %965 = vmatpush.bf16.msra.mxu0 %v1680_v28  ;;  %v1711_v28 = vld [vmem:[%s2150_s3] sm:$0xff] }
  0x4f   :  { %991 = vmatpush.bf16.msra.mxu2 %v1696_v29 }
  0x50   :  { %1004 = vmatpush.bf16.msra.mxu3 %v1704_v30 }
  0x51   :  { %978 = vmatpush.bf16.msra.mxu1 %v1688_v31 }
  0x52   :  { %966 = vmatpush.bf16.msra.mxu0 %v1679_v32 }
  0x53   :  { %992 = vmatpush.bf16.msra.mxu2 %v1695_v33 }
  0x54   :  { %1005 = vmatpush.bf16.msra.mxu3 %v1703_v34 }
  0x55   :  { %979 = vmatpush.bf16.msra.mxu1 %v1687_v35 }
  0x56   :  { %967 = vmatpush.bf16.msra.mxu0 %v1678_v36 }
  0x57   :  { %993 = vmatpush.bf16.msra.mxu2 %v1694_v37 }
  0x58   :  { %1006 = vmatpush.bf16.msra.mxu3 %v1702_v38 }
  0x59   :  { %980 = vmatpush.bf16.msra.mxu1 %v1686_v39 }
  0x5a   :  { %968 = vmatpush.bf16.msra.mxu0 %v1677_v42 }
  0x5b   :  { %994 = vmatpush.bf16.msra.mxu2 %v1693_v43 }
  0x5c   :  { %1007 = vmatpush.bf16.msra.mxu3 %v1701_v44 }
  0x5d   :  { %981 = vmatpush.bf16.msra.mxu1 %v1685_v45 }
  0x5e   :  { %969 = vmatpush.bf16.msra.mxu0 %v1676_v47 }
  0x5f   :  { %995 = vmatpush.bf16.msra.mxu2 %v1692_v48 }
  0x60   :  { %1008 = vmatpush.bf16.msra.mxu3 %v1700_v51  ;;  %v1721_v51 = vld [vmem:[%s2149_s4] ss:$0 sm:$0xff] }
  0x61   :  { %982 = vmatpush.bf16.msra.mxu1 %v1684_v53  ;;  %970 = vmatmul.bf16.vlgmr.msra.gmra.mxu0 %v50_v56 }
  0x62   :  { %1019 = vmatpush.bf16.msrb.mxu0 %v856_v54  ;;  %996 = vmatmul.bf16.vlgmr.msra.gmra.mxu2 %v52_v57  ;;  %v1722_v54 = vld [vmem:[%s2151_s5] ss:$0 sm:$0xff] }
  0x63   :  { %1009 = vmatmul.bf16.vlgmr.msra.gmra.mxu3 %v53_v58 }
  0x64   :  { %983 = vmatmul.bf16.vlgmr.msra.gmra.mxu1 %v51_v59  ;;  %v1723_v59 = vld [vmem:[#allocation2] ss:$0 sm:$0xff] }
  0x65   :  { %1097 = vmatpush.bf16.msrb.mxu1 %v1718_v3 }
  0x66   :  { %1020 = vmatpush.bf16.msrb.mxu0 %v1709_v60 }
  0x69   :  { %1098 = vmatpush.bf16.msrb.mxu1 %v1717_v7 }
  0x6a   :  { %1021 = vmatpush.bf16.msrb.mxu0 %v1708_v61 }
  0x6d   :  { %1099 = vmatpush.bf16.msrb.mxu1 %v1716_v10 }
  0x71   :  { %1578 = vmatmul.msk.bf16.vlgmr.msrb.gmra.mxu0 %vm850_vm1, %v54_v63  ;;  %1100 = vmatpush.bf16.msrb.mxu1 %v1715_v12 }
  0x75   :  { %1101 = vmatpush.bf16.msrb.mxu1 %v1714_v16 }
  0x79   :  { %1102 = vmatpush.bf16.msrb.mxu1 %v1713_v19 }
  0x7d   :  { %1103 = vmatpush.bf16.msrb.mxu1 %v1712_v24 }
  0x81   :  { %1104 = vmatpush.bf16.msrb.mxu1 %v1711_v28 }
  0x9e   :  { %v867_v0 = vpop.f32.mrf.mxu0 }
  0x9f   :  { %v868_v15 = vadd.f32 %v1720_v11, %v867_v0 }
  0xa1   :  { %v880_v1 = vpop.f32.mrf.mxu1 }
  0xa2   :  { %v881_v20 = vadd.f32 %v880_v1, %v868_v15 }
  0xa5   :  { %v893_v2 = vpop.f32.mrf.mxu2 }
  0xa6   :  { %v906_v4 = vpop.f32.mrf.mxu3  ;;  %v869_v5 = vpop.f32.mrf.mxu0  ;;  %v894_v23 = vadd.f32 %v893_v2, %v881_v20 }
  0xa8   :  { %v907_v27 = vadd.f32 %v906_v4, %v894_v23 }
  0xa9   :  { %v882_v6 = vpop.f32.mrf.mxu1 }
  0xad   :  { %v895_v8 = vpop.f32.mrf.mxu2 }
  0xae   :  { %v908_v9 = vpop.f32.mrf.mxu3 }
  0xbe   :  { %v919_v13 = vpop.f32.mrf.mxu0 }
  0xbf   :  { %v920_v29 = vadd.f32 %v919_v13, %v907_v27 }
  0xc1   :  { %v932_v14 = vpop.f32.mrf.mxu1 }
  0xc2   :  { %v933_v30 = vadd.f32 %v932_v14, %v920_v29 }
  0xc5   :  { %v945_v17 = vpop.f32.mrf.mxu2 }
  0xc6   :  { %v958_v18 = vpop.f32.mrf.mxu3  ;;  %v921_v21 = vpop.f32.mrf.mxu0  ;;  %v946_v31 = vadd.f32 %v945_v17, %v933_v30 }
  0xc8   :  { %v959_v34 = vadd.f32 %v958_v18, %v946_v31 }
  0xc9   :  { %v934_v22 = vpop.f32.mrf.mxu1 }
  0xcd   :  { %v947_v25 = vpop.f32.mrf.mxu2 }
  0xce   :  { %v960_v26 = vpop.f32.mrf.mxu3 }
  0xde   :  { %v971_v32 = vpop.f32.mrf.mxu0 }
  0xdf   :  { %v972_v35 = vadd.f32 %v971_v32, %v959_v34 }
  0xe1   :  { %v984_v33 = vpop.f32.mrf.mxu1 }
  0xe2   :  { %v985_v39 = vadd.f32 %v984_v33, %v972_v35 }
  0xe5   :  { %v997_v36 = vpop.f32.mrf.mxu2 }
  0xe6   :  { %v1010_v37 = vpop.f32.mrf.mxu3  ;;  %v973_v38 = vpop.f32.mrf.mxu0  ;;  %v998_v41 = vadd.f32 %v997_v36, %v985_v39 }
  0xe8   :  { %v1011_v43 = vadd.f32 %v1010_v37, %v998_v41 }
  0xe9   :  { %v986_v40 = vpop.f32.mrf.mxu1 }
  0xed   :  { %v999_v42 = vpop.f32.mrf.mxu2 }
  0xee   :  { %v1012_v44 = vpop.f32.mrf.mxu3  ;;  %v1023_v45 = vpop.f32.mrf.mxu0 }
  0xef   :  { %v1024_v46 = vadd.f32 %v1023_v45, %v1011_v43 }
  0xf1   :  { %v1027_v47 = vmax.f32 %v1024_v46, 0.0 }
  0xf3   :  { %v1028_v48 = vpack.c.bf16 %v1027_v47, %v1027_v47 }
  0xf5   :  { %1105 = vmatmul.bf16.vlgmr.msrb.gmra.mxu1 %v1028_v48 }
  0xf6   :  { %v1025_v49 = vpop.f32.mrf.mxu0 }
 0x172   :  { %v1106_v52 = vpop.f32.mrf.mxu1 }
 0x173   :  { %v1107_v53 = vadd.f32 %v1721_v51, %v1106_v52 }
 0x175   :  { %v1110_v55 = vmax.f32 %v1107_v53, 0.0 }
 0x177   :  { %v1115_v56 = vmul.f32 %v1722_v54, %v1110_v55 }
 0x179   :  { %v1117_v57 = vsel %vm1116_vm2, %v1115_v56, 0.0 }
 0x17a   :  { %v1108_v58 = vpop.f32.mrf.mxu1  ;;  %1118 = vadd.xlane.f32.xlu0 %v1117_v57 }
 0x1ed   :  { %v1119_v60 = vpop.xlane.xlu0 %1118 }
 0x1ee   :  { %v1124_v61 = vadd.f32 %v1723_v59, %v1119_v60 }
 0x1f0   :  { %v1611_v62 = vmul.f32 -1.442695, %v1124_v61 }
 0x1f2   :  { %1724 = vpow2.f32 %v1611_v62 }
 0x1f8   :  { %v1725_v63 = vpop.eup %1724 }
 0x1f9   :  { %v1128_v0 = vadd.f32 1.0, %v1725_v63 }
 0x1fb   :  { %1726 = vrcp.f32 %v1128_v0  ;;  %v1140_v4 = vand.u32 2147483648, %v1128_v0  ;;  %v1138_v6 = vand.u32 2147483647, %v1128_v0  ;;  %vm1134_vm4 = vweird.f32 %v1128_v0 }
 0x1fd   :  { %v1141_v8 = vor.u32 1.1754944e-38, %v1140_v4  ;;  %vm1139_vm6 = vcmp.eq.f32.partialorder %v1138_v6, 8.507059e+37 }
 0x201   :  { %v1727_v1 = vpop.eup %1726 }
 0x202   :  { %v1130_v2 = vmul.f32 %v1727_v1, %v1128_v0  ;;  %vm1135_vm3 = vweird.f32 %v1727_v1 }
 0x203   :  { %vm1136_vm5 = vmor %vm1134_vm4, %vm1135_vm3 }
 0x204   :  { %v1131_v3 = vsub.f32 1.0, %v1130_v2 }
 0x206   :  { %v1132_v5 = vmul.f32 %v1727_v1, %v1131_v3 }
 0x208   :  { %v1133_v7 = vadd.f32 %v1727_v1, %v1132_v5 }
 0x20a   :  { %v1137_v9 = vsel %vm1136_vm5, %v1727_v1, %v1133_v7 }
 0x20b   :  { %v1142_v10 = vsel %vm1139_vm6, %v1141_v8, %v1137_v9 }
 0x20c   :  { %1144 = vxpose.xlu0.b32.start.end [1/1] (short) (narrow) %v1142_v10, 8 }
 0x2b0   :  { %v1160_v11 = vpop.trf.xlu0 }
 0x2b1   :  { %1177 = vst.msk [vmem:[%s2153_s7] sm:$0x1] %vm1176_vm7, %v1160_v11 }

</bundles_post_ra>
